<compile_context>
chip_gen: v6e
topology: v6e:2x2x1
jax: 0.10.0
libtpu: 0.0.40
codegen_flags: <defaults>
</compile_context>

<pallas_src>
import math

import jax
import jax.numpy as jnp
from jax.experimental import pallas as pl
from jax.experimental.pallas import tpu as pltpu

# f32 everywhere: avoids the bf16xbf16->f32 dot the executor rejected and keeps
# kernel/reference numerics identical. Flip to jnp.bfloat16 on real bf16 HW.
COMPUTE_DTYPE = jnp.float32


# ----------------------------------------------------------------------------
# Pallas kernel: per-expert FFN + gated accumulation over experts.
# Grid = (token_tiles, num_experts); expert axis is a reduction ("arbitrary");
# the f32 output tile stays resident across it and is accumulated in place.
# ----------------------------------------------------------------------------
def _make_moe_kernel(num_experts: int, weights_resident: bool):
    def kernel(mask_ref, x_ref, g_ref, w1_ref, b1_ref, w2_ref, b2_ref, out_ref):
        i = pl.program_id(0)
        e = pl.program_id(1)

        @pl.when(e == 0)
        def _init():
            out_ref[...] = jnp.zeros_like(out_ref)

        # Skip experts that no token in this tile is routed to (gate == 0 for
        # the whole tile) -- saves both MXU passes for that (tile, expert).
        @pl.when(mask_ref[i * num_experts + e] > 0)
        def _compute():
            w_idx = e if weights_resident else 0
            w1 = w1_ref[w_idx]          # (D, H)
            w2 = w2_ref[w_idx]          # (H, O)
            b1 = b1_ref[e]              # (1, H)  (biases always resident)
            b2 = b2_ref[e]              # (1, O)

            # Expert FFN: Linear -> GELU -> (dropout=identity in eval) -> Linear
            h = jnp.dot(x_ref[...], w1,
                        preferred_element_type=jnp.float32) + b1
            h = jax.nn.gelu(h)                                   # f32, tanh approx
            y = jnp.dot(h, w2,
                        preferred_element_type=jnp.float32) + b2

            # Gate column for expert e, extracted with an iota mask.
            col = jax.lax.broadcasted_iota(jnp.int32, g_ref.shape, 1)
            g = jnp.sum(jnp.where(col == e, g_ref[...], 0.0),
                        axis=1, keepdims=True)                   # (tile_m, 1) f32

            out_ref[...] += g * y

    return kernel


def moe_expert_combine(x2, gates2, w1, b1, w2, b2, tile_mask, *, tile_m):
    N, D = x2.shape
    E, _, H = w1.shape
    O = w2.shape[-1]
    num_tiles = N // tile_m

    xc = x2.astype(COMPUTE_DTYPE)
    w1c = w1.astype(COMPUTE_DTYPE)
    w2c = w2.astype(COMPUTE_DTYPE)
    b1r = b1.reshape(E, 1, H).astype(jnp.float32)
    b2r = b2.reshape(E, 1, O).astype(jnp.float32)
    g32 = gates2.astype(jnp.float32)

    itemsize = jnp.dtype(COMPUTE_DTYPE).itemsize
    # Keep the whole weight stack VMEM-resident (DMA'd once) when small enough;
    # otherwise stream one expert's weights per grid step.
    w_bytes = E * (D * H + H * O) * itemsize
    b_bytes = E * (H + O) * 4
    weights_resident = (w_bytes + b_bytes) <= (16 << 20)

    if weights_resident:
        w1_spec = pl.BlockSpec((E, D, H), lambda i, e, m: (0, 0, 0))
        w2_spec = pl.BlockSpec((E, H, O), lambda i, e, m: (0, 0, 0))
    else:
        w1_spec = pl.BlockSpec((1, D, H), lambda i, e, m: (e, 0, 0))
        w2_spec = pl.BlockSpec((1, H, O), lambda i, e, m: (e, 0, 0))
    b1_spec = pl.BlockSpec((E, 1, H), lambda i, e, m: (0, 0, 0))
    b2_spec = pl.BlockSpec((E, 1, O), lambda i, e, m: (0, 0, 0))

    # VMEM budget: double-buffered tiles + (resident or per-expert) weights
    # + intermediates.  Clamp to [32 MiB, 64 MiB] so it stays within physical
    # VMEM on v7x while exceeding the default scoped limit when useful.
    tile_bytes = 2 * tile_m * (D * itemsize + E * 4 + O * 4) + tile_m * H * 8
    need = (2 * (w_bytes + b_bytes) if weights_resident
            else 3 * (w_bytes // E) + 2 * b_bytes) + tile_bytes
    vmem_limit = int(min(64 << 20, max(32 << 20, 2 * need)))

    kernel = _make_moe_kernel(E, weights_resident)

    return pl.pallas_call(
        kernel,
        out_shape=jax.ShapeDtypeStruct((N, O), jnp.float32),
        grid_spec=pltpu.PrefetchScalarGridSpec(
            num_scalar_prefetch=1,
            grid=(num_tiles, E),
            in_specs=[
                pl.BlockSpec((tile_m, D), lambda i, e, m: (i, 0)),
                pl.BlockSpec((tile_m, E), lambda i, e, m: (i, 0)),
                w1_spec, b1_spec, w2_spec, b2_spec,
            ],
            out_specs=pl.BlockSpec((tile_m, O), lambda i, e, m: (i, 0)),
        ),
        compiler_params=pltpu.CompilerParams(
            dimension_semantics=("parallel", "arbitrary"),
            vmem_limit_bytes=vmem_limit),
    )(tile_mask, xc, g32, w1c, b1r, w2c, b2r)


# ----------------------------------------------------------------------------
# Router (plain JAX glue: top-k / capacity bookkeeping has no clean
# vector-kernel form and is negligible compute).
# ----------------------------------------------------------------------------
def moe_router(x, wr, br, num_experts, k, capacity_factor):
    B, S, _ = x.shape
    logits = jnp.einsum('bsd,de->bse', x, wr) + br
    probs = jax.nn.softmax(logits, axis=-1)
    top_vals, top_idx = jax.lax.top_k(probs, k)                    # [B,S,k]
    capacity = int(math.ceil(capacity_factor * k * S / num_experts))

    oh = jax.nn.one_hot(top_idx, num_experts, dtype=probs.dtype)   # [B,S,k,E]
    # rank-major slot assignment within each expert (GShard-style)
    oh_rank = jnp.transpose(oh, (0, 2, 1, 3)).reshape(B, k * S, num_experts)
    pos = jnp.cumsum(oh_rank, axis=1) - oh_rank
    keep = (pos < capacity).astype(probs.dtype) * oh_rank
    keep = keep.reshape(B, k, S, num_experts).transpose(0, 2, 1, 3)  # [B,S,k,E]
    gates = jnp.sum(top_vals[..., None] * keep, axis=2)              # [B,S,E]

    # Switch/GShard-style load-balancing auxiliary loss
    density = jnp.mean(jnp.sum(oh, axis=2), axis=(0, 1))
    density_proxy = jnp.mean(probs, axis=(0, 1))
    aux_loss = num_experts * jnp.sum(density * density_proxy) / k
    metrics = {'expert_usage': density, 'mean_router_prob': density_proxy}
    return gates, aux_loss, metrics


# ----------------------------------------------------------------------------
# Full MoE forward
# ----------------------------------------------------------------------------
def mixture_of_experts_forward(x, params, *, k=2, capacity_factor=1.5):
    B, S, D = x.shape
    E = params['w1'].shape[0]
    O = params['w2'].shape[-1]

    gates, aux_loss, metrics = moe_router(
        x, params['wr'], params['br'], E, k, capacity_factor)

    N = B * S
    x2 = x.reshape(N, D)
    g2 = gates.reshape(N, E)

    # Token tile: up to 512 rows (8-aligned) so the kernel is not
    # weight-stream bound; pad N so the tile evenly divides it (padded gates
    # are 0 -> padded rows contribute nothing and are sliced off).
    n8 = ((N + 7) // 8) * 8
    tile_m = min(512, n8)
    n_pad = ((N + tile_m - 1) // tile_m) * tile_m
    if n_pad != N:
        x2 = jnp.pad(x2, ((0, n_pad - N), (0, 0)))
        g2 = jnp.pad(g2, ((0, n_pad - N), (0, 0)))

    num_tiles = n_pad // tile_m
    # [num_tiles * E] int32 "this tile uses this expert" mask (scalar prefetch)
    tile_mask = jnp.any(
        g2.reshape(num_tiles, tile_m, E) != 0, axis=1).astype(jnp.int32).reshape(-1)

    out2 = moe_expert_combine(
        x2, g2, params['w1'], params['b1'], params['w2'], params['b2'],
        tile_mask, tile_m=tile_m)
    out = out2[:N].reshape(B, S, O).astype(x.dtype)
    return out, {'router': metrics, 'aux_loss': aux_loss}


def _reference_forward(x, params, gates):
    """Pure-JAX reference of the expert+combine hot path (f32 throughout)."""
    h = jnp.einsum('bsd,edh->bseh', x.astype(jnp.float32),
                   params['w1'].astype(jnp.float32),
                   preferred_element_type=jnp.float32) + params['b1']
    h = jax.nn.gelu(h)
    y = jnp.einsum('bseh,eho->bseo', h, params['w2'].astype(jnp.float32),
                   preferred_element_type=jnp.float32) + params['b2']
    return jnp.sum(gates[..., None] * y, axis=2)


if __name__ == "__main__":
    # Small shapes consistent with the module: [batch, seq, input_dim]
    B, S = 2, 8
    input_dim, hidden_dim, output_dim = 32, 64, 32
    num_experts, k = 4, 2

    key = jax.random.PRNGKey(0)
    ks = jax.random.split(key, 8)
    params = {
        'wr': 0.05 * jax.random.normal(ks[0], (input_dim, num_experts), jnp.float32),
        'br': jnp.zeros((num_experts,), jnp.float32),
        'w1': 0.05 * jax.random.normal(ks[1], (num_experts, input_dim, hidden_dim), jnp.float32),
        'b1': 0.01 * jax.random.normal(ks[2], (num_experts, hidden_dim), jnp.float32),
        'w2': 0.05 * jax.random.normal(ks[3], (num_experts, hidden_dim, output_dim), jnp.float32),
        'b2': 0.01 * jax.random.normal(ks[4], (num_experts, output_dim), jnp.float32),
    }
    x = jax.random.normal(ks[5], (B, S, input_dim), jnp.float32)

    out, aux = mixture_of_experts_forward(x, params, k=k, capacity_factor=1.5)
    out = jax.block_until_ready(out)

    # sanity check vs pure-JAX reference of the kernel's hot path
    gates, _, _ = moe_router(x, params['wr'], params['br'], num_experts, k, 1.5)
    ref = jax.block_until_ready(_reference_forward(x, params, gates))
    assert out.shape == (B, S, output_dim)
    assert bool(jnp.allclose(out, ref.astype(out.dtype), atol=1e-3, rtol=1e-3))

    print("KERNEL_OK")
</pallas_src>

<mosaic_0001>
module attributes {stable_mosaic.version = 11 : i64} {
  func.func @kernel(%arg0: i32, %arg1: i32, %arg2: memref<4xi32, #tpu.memory_space<smem>>, %arg3: memref<16x32xf32, #tpu.memory_space<vmem>>, %arg4: memref<16x4xf32, #tpu.memory_space<vmem>>, %arg5: memref<4x32x64xf32, #tpu.memory_space<vmem>>, %arg6: memref<4x1x64xf32, #tpu.memory_space<vmem>>, %arg7: memref<4x64x32xf32, #tpu.memory_space<vmem>>, %arg8: memref<4x1x32xf32, #tpu.memory_space<vmem>>, %arg9: memref<16x32xf32, #tpu.memory_space<vmem>>) attributes {dimension_semantics = [#tpu.dimension_semantics<parallel>, #tpu.dimension_semantics<arbitrary>], iteration_bounds = array<i64: 1, 4>, scalar_prefetch = 1 : i64, scratch_operands = 0 : i64, tpu.core_type = #tpu.core_type<tc>, window_params = [{transform_indices = @transform_0, window_bounds = array<i64: 16, 32>}, {transform_indices = @transform_1, window_bounds = array<i64: 16, 4>}, {pipeline_mode = #tpu.pipeline_mode<synchronous>, transform_indices = @transform_2, window_bounds = array<i64: 4, 32, 64>}, {pipeline_mode = #tpu.pipeline_mode<synchronous>, transform_indices = @transform_3, window_bounds = array<i64: 4, 1, 64>}, {pipeline_mode = #tpu.pipeline_mode<synchronous>, transform_indices = @transform_4, window_bounds = array<i64: 4, 64, 32>}, {pipeline_mode = #tpu.pipeline_mode<synchronous>, transform_indices = @transform_5, window_bounds = array<i64: 4, 1, 32>}, {transform_indices = @transform_6, window_bounds = array<i64: 16, 32>}]} {
    %c0_i32 = arith.constant 0 : i32
    %0 = arith.cmpi eq, %arg1, %c0_i32 : i32
    %1 = arith.extui %0 : i1 to i32
    %c0_i32_0 = arith.constant 0 : i32
    %2 = arith.cmpi ne, %1, %c0_i32_0 : i32
    scf.if %2 {
      %cst = arith.constant 0.000000e+00 : f32
      %10 = vector.broadcast %cst : f32 to vector<16x32xf32>
      %c0 = arith.constant 0 : index
      %c0_3 = arith.constant 0 : index
      %11 = vector.load %arg9[%c0, %c0_3] : memref<16x32xf32, #tpu.memory_space<vmem>>, vector<16x32xf32>
      tpu.vector_store %arg9[%c0, %c0_3], %10 {strides = array<i32>} : memref<16x32xf32, #tpu.memory_space<vmem>>, vector<16x32xf32>,
    } else {
    }
    %c4_i32 = arith.constant 4 : i32
    %3 = arith.muli %arg0, %c4_i32 : i32
    %4 = arith.addi %3, %arg1 : i32
    %5 = arith.index_cast %4 : i32 to index
    %6 = memref.load %arg2[%5] : memref<4xi32, #tpu.memory_space<smem>>
    %c0_i32_1 = arith.constant 0 : i32
    %7 = arith.cmpi sgt, %6, %c0_i32_1 : i32
    %8 = arith.extui %7 : i1 to i32
    %c0_i32_2 = arith.constant 0 : i32
    %9 = arith.cmpi ne, %8, %c0_i32_2 : i32
    scf.if %9 {
      %10 = arith.index_cast %arg1 : i32 to index
      %c0 = arith.constant 0 : index
      %c0_3 = arith.constant 0 : index
      %11 = vector.load %arg5[%10, %c0, %c0_3] : memref<4x32x64xf32, #tpu.memory_space<vmem>>, vector<1x32x64xf32>
      %12 = vector.shape_cast %11 : vector<1x32x64xf32> to vector<32x64xf32>
      %13 = arith.index_cast %arg1 : i32 to index
      %c0_4 = arith.constant 0 : index
      %c0_5 = arith.constant 0 : index
      %14 = vector.load %arg7[%13, %c0_4, %c0_5] : memref<4x64x32xf32, #tpu.memory_space<vmem>>, vector<1x64x32xf32>
      %15 = vector.shape_cast %14 : vector<1x64x32xf32> to vector<64x32xf32>
      %16 = arith.index_cast %arg1 : i32 to index
      %c0_6 = arith.constant 0 : index
      %c0_7 = arith.constant 0 : index
      %17 = vector.load %arg6[%16, %c0_6, %c0_7] : memref<4x1x64xf32, #tpu.memory_space<vmem>>, vector<1x1x64xf32>
      %18 = vector.shape_cast %17 : vector<1x1x64xf32> to vector<1x64xf32>
      %19 = arith.index_cast %arg1 : i32 to index
      %c0_8 = arith.constant 0 : index
      %c0_9 = arith.constant 0 : index
      %20 = vector.load %arg8[%19, %c0_8, %c0_9] : memref<4x1x32xf32, #tpu.memory_space<vmem>>, vector<1x1x32xf32>
      %21 = vector.shape_cast %20 : vector<1x1x32xf32> to vector<1x32xf32>
      %c0_10 = arith.constant 0 : index
      %c0_11 = arith.constant 0 : index
      %22 = vector.load %arg3[%c0_10, %c0_11] : memref<16x32xf32, #tpu.memory_space<vmem>>, vector<16x32xf32>
      %cst = arith.constant dense<0.000000e+00> : vector<16x64xf32>
      %23 = tpu.matmul %22, %12, %cst {dimension_numbers = #tpu.dot_dimension_numbers<[1], [0], [0], [1], [0, 0, 1, 1], [], []>} : vector<16x32xf32>, vector<32x64xf32>, vector<16x64xf32> -> vector<16x64xf32>
      %24 = vector.broadcast %18 : vector<1x64xf32> to vector<16x64xf32>
      %25 = arith.addf %23, %24 : vector<16x64xf32>
      %26 = arith.mulf %25, %25 : vector<16x64xf32>
      %27 = arith.mulf %25, %26 : vector<16x64xf32>
      %cst_12 = arith.constant 4.471500e-02 : f32
      %28 = vector.broadcast %cst_12 : f32 to vector<16x64xf32>
      %29 = arith.mulf %28, %27 : vector<16x64xf32>
      %30 = arith.addf %25, %29 : vector<16x64xf32>
      %cst_13 = arith.constant 0.797884583 : f32
      %31 = vector.broadcast %cst_13 : f32 to vector<16x64xf32>
      %32 = arith.mulf %31, %30 : vector<16x64xf32>
      %33 = math.tanh %32 : vector<16x64xf32>
      %cst_14 = arith.constant 1.000000e+00 : f32
      %34 = vector.broadcast %cst_14 : f32 to vector<16x64xf32>
      %35 = arith.addf %34, %33 : vector<16x64xf32>
      %cst_15 = arith.constant 5.000000e-01 : f32
      %36 = vector.broadcast %cst_15 : f32 to vector<16x64xf32>
      %37 = arith.mulf %36, %35 : vector<16x64xf32>
      %38 = arith.mulf %25, %37 : vector<16x64xf32>
      %cst_16 = arith.constant dense<0.000000e+00> : vector<16x32xf32>
      %39 = tpu.matmul %38, %15, %cst_16 {dimension_numbers = #tpu.dot_dimension_numbers<[1], [0], [0], [1], [0, 0, 1, 1], [], []>} : vector<16x64xf32>, vector<64x32xf32>, vector<16x32xf32> -> vector<16x32xf32>
      %40 = vector.broadcast %21 : vector<1x32xf32> to vector<16x32xf32>
      %41 = arith.addf %39, %40 : vector<16x32xf32>
      %42 = tpu.iota {dimensions = array<i32: 1>} : vector<16x4xi32>
      %43 = vector.broadcast %arg1 : i32 to vector<16x4xi32>
      %44 = arith.cmpi eq, %42, %43 : vector<16x4xi32>
      %c0_17 = arith.constant 0 : index
      %c0_18 = arith.constant 0 : index
      %45 = vector.load %arg4[%c0_17, %c0_18] : memref<16x4xf32, #tpu.memory_space<vmem>>, vector<16x4xf32>
      %cst_19 = arith.constant 0.000000e+00 : f32
      %46 = vector.broadcast %cst_19 : f32 to vector<16x4xf32>
      %47 = arith.select %44, %45, %46 : vector<16x4xi1>, vector<16x4xf32>
      %cst_20 = arith.constant dense<0.000000e+00> : vector<16xf32>
      %48 = vector.multi_reduction <add>, %47, %cst_20 [1] : vector<16x4xf32> to vector<16xf32>
      %49 = vector.shape_cast %48 : vector<16xf32> to vector<16x1xf32>
      %c0_21 = arith.constant 0 : index
      %c0_22 = arith.constant 0 : index
      %50 = vector.load %arg9[%c0_21, %c0_22] : memref<16x32xf32, #tpu.memory_space<vmem>>, vector<16x32xf32>
      %51 = vector.broadcast %49 : vector<16x1xf32> to vector<16x32xf32>
      %52 = arith.mulf %51, %41 : vector<16x32xf32>
      %53 = arith.addf %50, %52 : vector<16x32xf32>
      %c0_23 = arith.constant 0 : index
      %c0_24 = arith.constant 0 : index
      %54 = vector.load %arg9[%c0_23, %c0_24] : memref<16x32xf32, #tpu.memory_space<vmem>>, vector<16x32xf32>
      tpu.vector_store %arg9[%c0_23, %c0_24], %53 {strides = array<i32>} : memref<16x32xf32, #tpu.memory_space<vmem>>, vector<16x32xf32>,
    } else {
    }
    return
  }
  func.func @transform_0(%arg0: i32, %arg1: i32, %arg2: memref<4xi32, #tpu.memory_space<smem>>) -> (i32, i32) {
    %c0_i32 = arith.constant 0 : i32
    %c0_i32_0 = arith.constant 0 : i32
    return %arg0, %c0_i32 : i32, i32
  }
  func.func @transform_1(%arg0: i32, %arg1: i32, %arg2: memref<4xi32, #tpu.memory_space<smem>>) -> (i32, i32) {
    %c0_i32 = arith.constant 0 : i32
    %c0_i32_0 = arith.constant 0 : i32
    return %arg0, %c0_i32 : i32, i32
  }
  func.func @transform_2(%arg0: i32, %arg1: i32, %arg2: memref<4xi32, #tpu.memory_space<smem>>) -> (i32, i32, i32) {
    %c0_i32 = arith.constant 0 : i32
    %c0_i32_0 = arith.constant 0 : i32
    %c0_i32_1 = arith.constant 0 : i32
    %c0_i32_2 = arith.constant 0 : i32
    return %c0_i32, %c0_i32_0, %c0_i32_1 : i32, i32, i32
  }
  func.func @transform_3(%arg0: i32, %arg1: i32, %arg2: memref<4xi32, #tpu.memory_space<smem>>) -> (i32, i32, i32) {
    %c0_i32 = arith.constant 0 : i32
    %c0_i32_0 = arith.constant 0 : i32
    %c0_i32_1 = arith.constant 0 : i32
    %c0_i32_2 = arith.constant 0 : i32
    return %c0_i32, %c0_i32_0, %c0_i32_1 : i32, i32, i32
  }
  func.func @transform_4(%arg0: i32, %arg1: i32, %arg2: memref<4xi32, #tpu.memory_space<smem>>) -> (i32, i32, i32) {
    %c0_i32 = arith.constant 0 : i32
    %c0_i32_0 = arith.constant 0 : i32
    %c0_i32_1 = arith.constant 0 : i32
    %c0_i32_2 = arith.constant 0 : i32
    return %c0_i32, %c0_i32_0, %c0_i32_1 : i32, i32, i32
  }
  func.func @transform_5(%arg0: i32, %arg1: i32, %arg2: memref<4xi32, #tpu.memory_space<smem>>) -> (i32, i32, i32) {
    %c0_i32 = arith.constant 0 : i32
    %c0_i32_0 = arith.constant 0 : i32
    %c0_i32_1 = arith.constant 0 : i32
    %c0_i32_2 = arith.constant 0 : i32
    return %c0_i32, %c0_i32_0, %c0_i32_1 : i32, i32, i32
  }
  func.func @transform_6(%arg0: i32, %arg1: i32, %arg2: memref<4xi32, #tpu.memory_space<smem>>) -> (i32, i32) {
    %c0_i32 = arith.constant 0 : i32
    %c0_i32_0 = arith.constant 0 : i32
    return %arg0, %c0_i32 : i32, i32
  }
}

</mosaic_0001>

<bundles_post_ra>
// kernel: tpu_custom_call.1
= control target key start
LH: loop header
LB: loop body
LE: loop exit
PB: predicated region body
PF: predicated region fallthrough
CT: control target
= control target key end

     0   :  { %s926_s0 = inlined_call_operand.vmem [shape: s32[4], index: 0, kind: input, shape index: {}]   ;;  %s927_s1 = inlined_call_operand.vmem [shape: f32[16,32], index: 1, kind: input, shape index: {}]   ;;  %s928_s2 = inlined_call_operand.vmem [shape: f32[16,4], index: 2, kind: input, shape index: {}]   ;;  %s929_s3 = inlined_call_operand.vmem [shape: f32[4,32,64], index: 3, kind: input, shape index: {}]   ;;  %s930_s4 = inlined_call_operand.vmem [shape: f32[4,1,64], index: 4, kind: input, shape index: {}]   ;;  %s931_s5 = inlined_call_operand.vmem [shape: f32[4,64,32], index: 5, kind: input, shape index: {}]   ;;  %s932_s6 = inlined_call_operand.vmem [shape: f32[4,1,32], index: 6, kind: input, shape index: {}]   ;;  %s933_s7 = inlined_call_operand.hbm [shape: f32[16,32], index: 7, kind: output, shape index: {}]  }
   0x1   :  { %s12_s26 = sshll.u32 %s926_s0, 4  ;;  %s13_s26 = int_to_ptr.vmem [resolvable:$true] %s12_s26 }
   0x2   :  { %s730_s27 = scalar_lea.vmem %s13_s26, 16  ;;  %p735_p1 = scmp.lt.s32.totalorder %s13_s26, %s13_s26 }
   0x3   :  { %p731_p0 = scmp.ne.s32.totalorder %s13_s26, %s730_s27  ;;  %p736_p2 = scmp.lt.s32.totalorder %s730_s27, %s730_s27 }
   0x5   :  { %p737_p3 = por %p736_p2, %p735_p1 }
   0x7   :  { %p738_p4 = pnand %p737_p3, %p731_p0 }
   0x9   :  { %741 = shalt.err (!%p738_p4)  }
   0xa   :  { %s796_s28 = smov [#allocation3]  }
   0xb   :  { %15 = dma.vmem_to_smem %s13_s26, 16, %s796_s28, [#allocation2] }
   0xc   :  { %778 = dma.done.wait [#allocation2], 16 }
   0xd   :  { %779 = vsyncadd [#allocation2], 4294967280 }
   0xe   :  { %17 = sfence }
   0xf   :  { %18 = vsyncpa [#allocation5], 0  ;;  %s844_s29 = smov 0   ;;  %s846_s30 = smov 0  }
  0x10   :  { %s848_s8 = smov 0  }
  0x11 LB: > { %s626_s0 = sadd.s32 4294967295, %s794_s8   ;;  %s33_s9 = sadd.s32 1, %s790_s30  ;;  %s794_s8 = sphi %s848_s8, %s24_s8   ;;  %s790_s30 = sphi %s846_s30, %s936_s30   ;;  %s786_s29 = sphi %s844_s29, %s935_s29  }
  0x12   : > { %p34_p5 = scmp.ge.s32.totalorder %s33_s9, 4  ;;  %p630_p6 = scmp.ge.s32.totalorder %s794_s8, 1 }
  0x13   : > { %p244_p7 = scmp.lt.s32.totalorder %s794_s8, 5 }
  0x14   : > { %s938_s9 = smov (%p34_p5, %s33_s9), 0 }
  0x15   : > { %p245_p8 = pnand %p630_p6, %p244_p7 }
  0x16   : > { %p631_p9 = scmp.ne.s32.totalorder (!%p245_p8), %s786_s29, 0 }
  0x17   : > { %248 = sbr.rel (%p245_p8) target bundleno = 503 (0x1f7), region = 44 }
  0x1c   : > { %290 = sbr.rel (%p631_p9) target bundleno = 35 (0x23), region = 48 }
  0x21   : > { %vm291_vm0 = vcmask 261120   ;;  %v797_v0 = vmov 0.0  }
  0x22   : > { %292 = vst.msk [vmem:[#allocation4] sm:$0xff] %vm291_vm0, %v797_v0  ;;  %293 = vst.msk [vmem:[#allocation4 + $0x8] sm:$0xff] %vm291_vm0, %v797_v0 }
  0x23 PF: > { %s296_s10 = sld [smem:[#allocation3 + %s786_s29]] }
  0x29   : > { %p632_p10 = scmp.le.s32.totalorder %s296_s10, 0 }
  0x2a   : > { %s633_s11 = sshll.u32 (!%p632_p10), %s786_s29, 5  ;;  %s634_s19 = sshll.u32 (!%p632_p10), %s786_s29, 6 }
  0x2b   : > { %300 = sbr.rel (%p632_p10) target bundleno = 487 (0x1e7), region = 52  ;;  %s302_s16 = scalar_lea.vmem (!%p632_p10), %s929_s3, %s633_s11 }
  0x2c   : > { %s308_s22 = scalar_lea.vmem (!%p632_p10), %s931_s5, %s634_s19  ;;  %s317_s10 = scalar_lea.vmem (!%p632_p10), %s930_s4, %s786_s29 }
  0x2d   : > { %s319_s13 = scalar_lea.vmem (!%p632_p10), %s932_s6, %s786_s29 }
  0x30   : > { %v321_v1 = vld [vmem:[%s927_s1] sm:$0xff]  ;;  %vm329_vm1 = vcmask 261120   ;;  %v306_v2 = vld [vmem:[%s302_s16 + $0x18] sm:$0xff]  ;;  %v305_v3 = vld [vmem:[%s302_s16 + $0x10] sm:$0xff]  ;;  %v517_v15 = vlaneseq  ;;  %v519_v16 = vstv %s786_s29  ;;  %vm525_vm2 = vcmask 31744  }
  0x31   : > { %669 = vmatprep.mubr.msk.f32.mxu0 %vm329_vm1, %v321_v1  ;;  %661 = vmatprep.subr.mxu0 %v306_v2  ;;  %v304_v4 = vld [vmem:[%s302_s16 + $0x8] sm:$0xff]  ;;  %v303_v5 = vld [vmem:[%s302_s16] sm:$0xff]  ;;  %v316_v7 = vld [vmem:[%s308_s22 + $0x38] sm:$0xff]  ;;  %vm435_vm4 = vcmask 523264  }
  0x32   : > { %662 = vmatpush3.msra.mxu0 %v306_v2  ;;  %v322_v6 = vld [vmem:[%s927_s1 + $0x8] sm:$0xff]  ;;  %v315_v8 = vld [vmem:[%s308_s22 + $0x30] sm:$0xff]  ;;  %672 = vmatprep.subr.mxu1 %v316_v7  ;;  %v313_v10 = vld [vmem:[%s308_s22 + $0x20] sm:$0xff]  ;;  %v518_v17 = vand.u32 127, %v517_v15 }
  0x33   : > { %663 = vmatprep.subr.mxu0 %v305_v3  ;;  %673 = vmatpush3.msra.mxu1 %v316_v7  ;;  %v314_v9 = vld [vmem:[%s308_s22 + $0x28] sm:$0xff]  ;;  %v312_v11 = vld [vmem:[%s308_s22 + $0x18] sm:$0xff]  ;;  %v311_v12 = vld [vmem:[%s308_s22 + $0x10] sm:$0xff] }
  0x34   : > { %664 = vmatpush3.msra.mxu0 %v305_v3  ;;  %674 = vmatprep.subr.mxu1 %v315_v8  ;;  %v310_v13 = vld [vmem:[%s308_s22 + $0x8] sm:$0xff]  ;;  %v309_v14 = vld [vmem:[%s308_s22] sm:$0xff]  ;;  %vm520_vm3 = vcmp.eq.s32.totalorder %v518_v17, %v519_v16 }
  0x35   : > { %665 = vmatprep.subr.mxu0 %v304_v4  ;;  %675 = vmatpush3.msra.mxu1 %v315_v8  ;;  %v521_v18 = vld [vmem:[%s928_s2] sm:$0xff]  ;;  %v522_v19 = vld [vmem:[%s928_s2 + $0x8] sm:$0xff] }
  0x36   : > { %666 = vmatpush3.msra.mxu0 %v304_v4  ;;  %676 = vmatprep.subr.mxu1 %v314_v9  ;;  %v523_v20 = vsel %vm520_vm3, %v521_v18, 0.0  ;;  %v524_v21 = vsel %vm520_vm3, %v522_v19, 0.0  ;;  %v635_v24 = vld [vmem:[%s317_s10] ss:$0 sm:$0xff]  ;;  %v533_v52 = vld [vmem:[#allocation4 + $0x8] sm:$0xff] }
  0x37   : > { %667 = vmatprep.subr.mxu0 %v303_v5  ;;  %677 = vmatpush3.msra.mxu1 %v314_v9  ;;  %v526_v22 = vsel %vm525_vm2, %v523_v20, 0.0  ;;  %v529_v23 = vsel %vm525_vm2, %v524_v21, 0.0  ;;  %v638_v48 = vld [vmem:[%s319_s13] ss:$0 sm:$0xff] }
  0x38   : > { %668 = vmatpush3.msra.mxu0 %v303_v5  ;;  %678 = vmatprep.subr.mxu1 %v313_v10  ;;  %v532_v56 = vld [vmem:[#allocation4] sm:$0xff] }
  0x39   : > { %670 = vmatmul.mubr.msk.f32.vlgmr.msra.gmra.mxu0 %vm329_vm1, %v322_v6  ;;  %679 = vmatpush3.msra.mxu1 %v313_v10 }
  0x3a   : > { %680 = vmatprep.subr.mxu1 %v312_v11  ;;  %527 = vadd.xlane.f32.xlu0 %v526_v22 }
  0x3b   : > { %681 = vmatpush3.msra.mxu1 %v312_v11 }
  0x3c   : > { %682 = vmatprep.subr.mxu1 %v311_v12 }
  0x3d   : > { %683 = vmatpush3.msra.mxu1 %v311_v12 }
  0x3e   : > { %684 = vmatprep.subr.mxu1 %v310_v13  ;;  %530 = vadd.xlane.f32.xlu0 %v529_v23 }
  0x3f   : > { %685 = vmatpush3.msra.mxu1 %v310_v13 }
  0x40   : > { %686 = vmatprep.subr.mxu1 %v309_v14 }
  0x41   : > { %687 = vmatpush3.msra.mxu1 %v309_v14 }
  0xc3   : > { %v528_v47 = vpop.xlane.xlu0 %527 }
  0xc7   : > { %v531_v50 = vpop.xlane.xlu0 %530 }
  0xf9   : > { %v671_v25 = vpop.f32.mrf.mxu0 }
  0xfa   : > { %v408_v26 = vadd.f32 %v671_v25, %v635_v24 }
  0xfb   : > { %v402_v27 = vpop.f32.mrf.mxu0 }
  0xfc   : > { %v412_v28 = vmul.f32 %v408_v26, %v408_v26  ;;  %v403_v29 = vadd.f32 %v635_v24, %v402_v27 }
  0xfe   : > { %v414_v30 = vmul.f32 %v412_v28, %v408_v26  ;;  %v411_v31 = vmul.f32 %v403_v29, %v403_v29 }
 0x100   : > { %v416_v32 = vmul.f32 0.044715, %v414_v30  ;;  %v413_v33 = vmul.f32 %v411_v31, %v403_v29 }
 0x102   : > { %v418_v34 = vadd.f32 %v416_v32, %v408_v26  ;;  %v415_v35 = vmul.f32 0.044715, %v413_v33 }
 0x104   : > { %v420_v36 = vmul.f32 0.7978846, %v418_v34  ;;  %v417_v37 = vadd.f32 %v415_v35, %v403_v29 }
 0x106   : > { %726 = vtanh.f32 %v420_v36  ;;  %v419_v38 = vmul.f32 0.7978846, %v417_v37 }
 0x108   : > { %728 = vtanh.f32 %v419_v38 }
 0x113   : > { %v727_v39 = vpop.eup %726 }
 0x114   : > { %v424_v40 = vadd.f32 1.0, %v727_v39 }
 0x115   : > { %v729_v41 = vpop.eup %728 }
 0x116   : > { %v423_v42 = vadd.f32 1.0, %v729_v41  ;;  %v426_v43 = vmul.f32 0.5, %v424_v40 }
 0x118   : > { %v425_v44 = vmul.f32 0.5, %v423_v42  ;;  %v428_v46 = vmul.f32 %v426_v43, %v408_v26 }
 0x11a   : > { %v427_v45 = vmul.f32 %v425_v44, %v403_v29 }
 0x11c   : > { %688 = vmatprep.mubr.msk.f32.mxu1 %vm435_vm4, %v427_v45 }
 0x11d   : > { %689 = vmatmul.mubr.msk.f32.vlgmr.msra.gmra.mxu1 %vm435_vm4, %v428_v46 }
 0x1dd   : > { %v690_v49 = vpop.f32.mrf.mxu1 }
 0x1de   : > { %v514_v51 = vadd.f32 %v690_v49, %v638_v48 }
 0x1df   : > { %v508_v53 = vpop.f32.mrf.mxu1 }
 0x1e0   : > { %v535_v54 = vmul.f32 %v531_v50, %v514_v51  ;;  %v509_v55 = vadd.f32 %v638_v48, %v508_v53 }
 0x1e2   : > { %v537_v57 = vadd.f32 %v535_v54, %v533_v52  ;;  %v534_v58 = vmul.f32 %v528_v47, %v509_v55 }
 0x1e4   : > { %539 = vst.msk [vmem:[#allocation4 + $0x8] sm:$0xff] %vm329_vm1, %v537_v57  ;;  %v536_v59 = vadd.f32 %v534_v58, %v532_v56 }
 0x1e6   : > { %538 = vst.msk [vmem:[#allocation4] sm:$0xff] %vm329_vm1, %v536_v59 }
 0x1e7 PF: > { %p902_p11 = scmp.eq.s32.totalorder %s626_s0, 3  ;;  %s798_s14 = smov [#allocation4]  }
 0x1e8   : > { %s549_s15 = sshll.u32 %s798_s14, 4  ;;  %s550_s15 = int_to_ptr.vmem [resolvable:$true] %s549_s15 }
 0x1e9   : > { %s742_s16 = scalar_lea.vmem %s550_s15, 256  ;;  %p749_p1 = scmp.lt.s32.totalorder %s550_s15, %s550_s15 }
 0x1ea   : > { %p743_p12 = scmp.ne.s32.totalorder %s550_s15, %s742_s16  ;;  %p750_p2 = scmp.lt.s32.totalorder %s742_s16, %s742_s16 }
 0x1ec   : > { %p744_p13 = pnand %p743_p12, %p902_p11  ;;  %p751_p3 = por %p750_p2, %p749_p1 }
 0x1ee   : > { %p745_p0 = pneg %p744_p13 }
 0x1f0   : > { %p752_p4 = pnand %p751_p3, %p745_p0 }
 0x1f2   : > { %755 = shalt.err (!%p752_p4)
}
 0x1f3   : > { %s799_s17 = smov 128   ;;  %s800_s0 = smov 8  }
 0x1f4   : > { %692 = dma.vmem_to_hbm [thread:$0]  (%p902_p11), %s550_s15, 256, %s933_s7, [#allocation5], %s799_s17, %s799_s17, %s800_s0  }
 0x1f5   : > { %781 = dma.done.wait (%p902_p11), [#allocation5], 256  }
 0x1f6   : > { %783 = vsyncadd (%p902_p11), [#allocation5], 4294967040 }
 0x1f7 PF: > { %s24_s8 = sadd.s32 1, %s794_s8   ;;  %s935_s29 = smov %s790_s30 }
 0x1f8   : > { %p21_p5 = scmp.ge.s32.totalorder %s24_s8, 6   ;;  %s936_s30 = smov %s938_s9 }
 0x1fa   :  { %23 = sbr.rel (!%p21_p5) target bundleno = 17 (0x11), region = 87 }
 0x1ff   :  { %565 = vsyncpa [#allocation5], 1 }
 0x200   :  { %567 = vsyncpa [#allocation5 + $0x1], 1 }

</bundles_post_ra>
